<compile_context>
chip_gen: v6e
topology: v6e:2x2x1
jax: 0.10.0
libtpu: 0.0.40
codegen_flags: <defaults>
</compile_context>

<pallas_src>
import jax
import jax.numpy as jnp
from jax.experimental import pallas as pl
from jax.experimental.pallas import tpu as pltpu


# ----------------------------------------------------------------------------
# Pallas kernel: fused  out = relu(x @ W1) @ W2  on one row tile
# ----------------------------------------------------------------------------
def _ffn_kernel(x_ref, w1_ref, w2_ref, out_ref):
    # x_ref  : (tm, dim)
    # w1_ref : (dim, inner_dim)      -- resident across grid steps
    # w2_ref : (inner_dim, dim)      -- resident across grid steps
    # out_ref: (tm, dim)
    h = jnp.dot(x_ref[...], w1_ref[...], preferred_element_type=jnp.float32)
    h = jnp.maximum(h, 0.0).astype(w2_ref.dtype)          # ReLU (dropout = id)
    y = jnp.dot(h, w2_ref[...], preferred_element_type=jnp.float32)
    out_ref[...] = y.astype(out_ref.dtype)


# ----------------------------------------------------------------------------
# Wrapper
# ----------------------------------------------------------------------------
def feed_forward(hidden_states, wi_weight, wo_weight, *, block_m=256):
    """hidden_states: (..., dim)
    wi_weight: (inner_dim, dim)   (PyTorch nn.Linear layout)
    wo_weight: (dim, inner_dim)   (PyTorch nn.Linear layout)
    """
    orig_shape = hidden_states.shape
    dim = orig_shape[-1]
    inner_dim = wi_weight.shape[0]
    assert wi_weight.shape == (inner_dim, dim)
    assert wo_weight.shape == (dim, inner_dim)

    m = 1
    for s in orig_shape[:-1]:
        m *= int(s)

    x2 = hidden_states.reshape(m, dim)
    # Pre-transpose once in the wrapper so the kernel is plain row-major matmuls.
    w1 = jnp.asarray(wi_weight).T        # (dim, inner_dim)
    w2 = jnp.asarray(wo_weight).T        # (inner_dim, dim)

    # Row-tile size: multiple of 8 (sublane), capped by block_m; pad ragged M.
    tm = min(block_m, max(8, ((m + 7) // 8) * 8))
    m_pad = ((m + tm - 1) // tm) * tm
    if m_pad != m:
        x2 = jnp.pad(x2, ((0, m_pad - m), (0, 0)))

    grid = (m_pad // tm,)

    out = pl.pallas_call(
        _ffn_kernel,
        out_shape=jax.ShapeDtypeStruct((m_pad, dim), hidden_states.dtype),
        grid_spec=pltpu.PrefetchScalarGridSpec(
            num_scalar_prefetch=0,
            grid=grid,
            in_specs=[
                pl.BlockSpec((tm, dim), lambda i: (i, 0)),            # x tile
                pl.BlockSpec((dim, inner_dim), lambda i: (0, 0)),     # W1 (shared)
                pl.BlockSpec((inner_dim, dim), lambda i: (0, 0)),     # W2 (shared)
            ],
            out_specs=pl.BlockSpec((tm, dim), lambda i: (i, 0)),
        ),
        compiler_params=pltpu.CompilerParams(
            dimension_semantics=("parallel",),
            vmem_limit_bytes=64 * 1024 * 1024,
        ),
    )(x2, w1, w2)

    if m_pad != m:
        out = out[:m]
    return out.reshape(orig_shape)


# ----------------------------------------------------------------------------
# Pure-JAX reference
# ----------------------------------------------------------------------------
def _reference(hidden_states, wi_weight, wo_weight):
    h = jnp.matmul(hidden_states, wi_weight.T)
    h = jnp.maximum(h, 0.0)
    # dropout in eval mode is identity
    return jnp.matmul(h, wo_weight.T)


if __name__ == "__main__":
    # small, deterministic config consistent with FeedForward(dim=32, mult=4)
    B, S, dim, mult = 2, 8, 32, 4
    inner_dim = dim * mult

    key = jax.random.PRNGKey(0)
    k_x, k_wi, k_wo = jax.random.split(key, 3)
    x = jax.random.normal(k_x, (B, S, dim), dtype=jnp.float32)
    wi_weight = jax.random.normal(k_wi, (inner_dim, dim), dtype=jnp.float32) * 0.05
    wo_weight = jax.random.normal(k_wo, (dim, inner_dim), dtype=jnp.float32) * 0.05

    out = feed_forward(x, wi_weight, wo_weight)
    out = jax.block_until_ready(out)

    ref = _reference(x, wi_weight, wo_weight)
    assert out.shape == (B, S, dim)
    assert jnp.allclose(out, ref, atol=1e-4, rtol=1e-4), "mismatch vs reference"

    print("KERNEL_OK")
</pallas_src>

<mosaic_0001>
module attributes {stable_mosaic.version = 11 : i64} {
  func.func @_ffn_kernel(%arg0: i32, %arg1: memref<16x32xf32, #tpu.memory_space<vmem>>, %arg2: memref<32x128xf32, #tpu.memory_space<vmem>>, %arg3: memref<128x32xf32, #tpu.memory_space<vmem>>, %arg4: memref<16x32xf32, #tpu.memory_space<vmem>>) attributes {dimension_semantics = [#tpu.dimension_semantics<parallel>], iteration_bounds = array<i64: 1>, scalar_prefetch = 0 : i64, scratch_operands = 0 : i64, tpu.core_type = #tpu.core_type<tc>, window_params = [{transform_indices = @transform_0, window_bounds = array<i64: 16, 32>}, {pipeline_mode = #tpu.pipeline_mode<synchronous>, transform_indices = @transform_1, window_bounds = array<i64: 32, 128>}, {pipeline_mode = #tpu.pipeline_mode<synchronous>, transform_indices = @transform_2, window_bounds = array<i64: 128, 32>}, {transform_indices = @transform_3, window_bounds = array<i64: 16, 32>}]} {
    %c0 = arith.constant 0 : index
    %c0_0 = arith.constant 0 : index
    %0 = vector.load %arg1[%c0, %c0_0] : memref<16x32xf32, #tpu.memory_space<vmem>>, vector<16x32xf32>
    %c0_1 = arith.constant 0 : index
    %c0_2 = arith.constant 0 : index
    %1 = vector.load %arg2[%c0_1, %c0_2] : memref<32x128xf32, #tpu.memory_space<vmem>>, vector<32x128xf32>
    %cst = arith.constant dense<0.000000e+00> : vector<16x128xf32>
    %2 = tpu.matmul %0, %1, %cst {dimension_numbers = #tpu.dot_dimension_numbers<[1], [0], [0], [1], [0, 0, 1, 1], [], []>} : vector<16x32xf32>, vector<32x128xf32>, vector<16x128xf32> -> vector<16x128xf32>
    %cst_3 = arith.constant 0.000000e+00 : f32
    %3 = vector.broadcast %cst_3 : f32 to vector<16x128xf32>
    %4 = arith.maximumf %2, %3 : vector<16x128xf32>
    %c0_4 = arith.constant 0 : index
    %c0_5 = arith.constant 0 : index
    %5 = vector.load %arg3[%c0_4, %c0_5] : memref<128x32xf32, #tpu.memory_space<vmem>>, vector<128x32xf32>
    %cst_6 = arith.constant dense<0.000000e+00> : vector<16x32xf32>
    %6 = tpu.matmul %4, %5, %cst_6 {dimension_numbers = #tpu.dot_dimension_numbers<[1], [0], [0], [1], [0, 0, 1, 1], [], []>} : vector<16x128xf32>, vector<128x32xf32>, vector<16x32xf32> -> vector<16x32xf32>
    %c0_7 = arith.constant 0 : index
    %c0_8 = arith.constant 0 : index
    %7 = vector.load %arg4[%c0_7, %c0_8] : memref<16x32xf32, #tpu.memory_space<vmem>>, vector<16x32xf32>
    tpu.vector_store %arg4[%c0_7, %c0_8], %6 {strides = array<i32>} : memref<16x32xf32, #tpu.memory_space<vmem>>, vector<16x32xf32>,
    return
  }
  func.func @transform_0(%arg0: i32) -> (i32, i32) {
    %c0_i32 = arith.constant 0 : i32
    %c0_i32_0 = arith.constant 0 : i32
    return %arg0, %c0_i32 : i32, i32
  }
  func.func @transform_1(%arg0: i32) -> (i32, i32) {
    %c0_i32 = arith.constant 0 : i32
    %c0_i32_0 = arith.constant 0 : i32
    %c0_i32_1 = arith.constant 0 : i32
    return %c0_i32, %c0_i32_0 : i32, i32
  }
  func.func @transform_2(%arg0: i32) -> (i32, i32) {
    %c0_i32 = arith.constant 0 : i32
    %c0_i32_0 = arith.constant 0 : i32
    %c0_i32_1 = arith.constant 0 : i32
    return %c0_i32, %c0_i32_0 : i32, i32
  }
  func.func @transform_3(%arg0: i32) -> (i32, i32) {
    %c0_i32 = arith.constant 0 : i32
    %c0_i32_0 = arith.constant 0 : i32
    return %arg0, %c0_i32 : i32, i32
  }
}

</mosaic_0001>

<bundles_post_ra>
// kernel: tpu_custom_call.1
= control target key start
LH: loop header
LB: loop body
LE: loop exit
PB: predicated region body
PF: predicated region fallthrough
CT: control target
= control target key end

     0   :  { %vm21_vm0 = vcmask 261120   ;;  %s407_s0 = inlined_call_operand.vmem [shape: f32[16,32], index: 0, kind: input, shape index: {}]   ;;  %s408_s1 = inlined_call_operand.vmem [shape: f32[32,128], index: 1, kind: input, shape index: {}]   ;;  %s409_s2 = inlined_call_operand.vmem [shape: f32[128,32], index: 2, kind: input, shape index: {}]   ;;  %s410_s3 = inlined_call_operand.hbm [shape: f32[16,32], index: 3, kind: output, shape index: {}]  }
   0x1   :  { %v20_v0 = vld [vmem:[%s408_s1 + $0x18] sm:$0xff]  ;;  %v19_v1 = vld [vmem:[%s408_s1 + $0x10] sm:$0xff]  ;;  %v15_v2 = vld [vmem:[%s407_s0] sm:$0xff] }
   0x2   :  { %240 = vmatprep.subr.mxu0 %v20_v0  ;;  %v18_v3 = vld [vmem:[%s408_s1 + $0x8] sm:$0xff]  ;;  %248 = vmatprep.mubr.msk.f32.mxu0 %vm21_vm0, %v15_v2  ;;  %v120_v4 = vld [vmem:[%s409_s2 + $0x78] sm:$0xff]  ;;  %v119_v5 = vld [vmem:[%s409_s2 + $0x70] sm:$0xff] }
   0x3   :  { %241 = vmatpush3.msra.mxu0 %v20_v0  ;;  %251 = vmatprep.subr.mxu1 %v120_v4  ;;  %v17_v6 = vld [vmem:[%s408_s1] sm:$0xff]  ;;  %v118_v7 = vld [vmem:[%s409_s2 + $0x68] sm:$0xff] }
   0x4   :  { %242 = vmatprep.subr.mxu0 %v19_v1  ;;  %252 = vmatpush3.msra.mxu1 %v120_v4  ;;  %v16_v8 = vld [vmem:[%s407_s0 + $0x8] sm:$0xff]  ;;  %v117_v9 = vld [vmem:[%s409_s2 + $0x60] sm:$0xff] }
   0x5   :  { %243 = vmatpush3.msra.mxu0 %v19_v1  ;;  %253 = vmatprep.subr.mxu1 %v119_v5 }
   0x6   :  { %244 = vmatprep.subr.mxu0 %v18_v3  ;;  %254 = vmatpush3.msra.mxu1 %v119_v5 }
   0x7   :  { %245 = vmatpush3.msra.mxu0 %v18_v3 }
   0x8   :  { %8 = vsyncpa [#allocation3], 0  ;;  %246 = vmatprep.subr.mxu0 %v17_v6  ;;  %255 = vmatprep.subr.mxu1 %v118_v7  ;;  %v116_v10 = vld [vmem:[%s409_s2 + $0x58] sm:$0xff]  ;;  %v115_v11 = vld [vmem:[%s409_s2 + $0x50] sm:$0xff]  ;;  %s311_s27 = smov [#allocation2]  }
   0x9   :  { %247 = vmatpush3.msra.mxu0 %v17_v6  ;;  %256 = vmatpush3.msra.mxu1 %v118_v7  ;;  %v114_v12 = vld [vmem:[%s409_s2 + $0x48] sm:$0xff]  ;;  %v113_v13 = vld [vmem:[%s409_s2 + $0x40] sm:$0xff]  ;;  %v112_v14 = vld [vmem:[%s409_s2 + $0x38] sm:$0xff]  ;;  %s203_s28 = sshll.u32 %s311_s27, 4  ;;  %s204_s28 = int_to_ptr.vmem [resolvable:$true] %s203_s28 }
   0xa   :  { %249 = vmatmul.mubr.msk.f32.vlgmr.msra.gmra.mxu0 %vm21_vm0, %v16_v8  ;;  %257 = vmatprep.subr.mxu1 %v117_v9  ;;  %v111_v15 = vld [vmem:[%s409_s2 + $0x30] sm:$0xff]  ;;  %v110_v16 = vld [vmem:[%s409_s2 + $0x28] sm:$0xff]  ;;  %v109_v17 = vld [vmem:[%s409_s2 + $0x20] sm:$0xff]  ;;  %s289_s29 = scalar_lea.vmem %s204_s28, 256  ;;  %p294_p1 = scmp.lt.s32.totalorder %s204_s28, %s204_s28 }
   0xb   :  { %258 = vmatpush3.msra.mxu1 %v117_v9  ;;  %v108_v18 = vld [vmem:[%s409_s2 + $0x18] sm:$0xff]  ;;  %v107_v19 = vld [vmem:[%s409_s2 + $0x10] sm:$0xff]  ;;  %v106_v20 = vld [vmem:[%s409_s2 + $0x8] sm:$0xff]  ;;  %p290_p0 = scmp.ne.s32.totalorder %s204_s28, %s289_s29  ;;  %p295_p2 = scmp.lt.s32.totalorder %s289_s29, %s289_s29 }
   0xc   :  { %259 = vmatprep.subr.mxu1 %v116_v10  ;;  %v105_v21 = vld [vmem:[%s409_s2] sm:$0xff] }
   0xd   :  { %260 = vmatpush3.msra.mxu1 %v116_v10  ;;  %p296_p3 = por %p295_p2, %p294_p1 }
   0xe   :  { %261 = vmatprep.subr.mxu1 %v115_v11 }
   0xf   :  { %262 = vmatpush3.msra.mxu1 %v115_v11  ;;  %p297_p4 = pnand %p296_p3, %p290_p0 }
  0x10   :  { %263 = vmatprep.subr.mxu1 %v114_v12 }
  0x11   :  { %264 = vmatpush3.msra.mxu1 %v114_v12 }
  0x12   :  { %265 = vmatprep.subr.mxu1 %v113_v13 }
  0x13   :  { %266 = vmatpush3.msra.mxu1 %v113_v13 }
  0x14   :  { %267 = vmatprep.subr.mxu1 %v112_v14 }
  0x15   :  { %268 = vmatpush3.msra.mxu1 %v112_v14 }
  0x16   :  { %269 = vmatprep.subr.mxu1 %v111_v15 }
  0x17   :  { %270 = vmatpush3.msra.mxu1 %v111_v15 }
  0x18   :  { %271 = vmatprep.subr.mxu1 %v110_v16 }
  0x19   :  { %272 = vmatpush3.msra.mxu1 %v110_v16 }
  0x1a   :  { %273 = vmatprep.subr.mxu1 %v109_v17 }
  0x1b   :  { %274 = vmatpush3.msra.mxu1 %v109_v17 }
  0x1c   :  { %275 = vmatprep.subr.mxu1 %v108_v18 }
  0x1d   :  { %276 = vmatpush3.msra.mxu1 %v108_v18 }
  0x1e   :  { %277 = vmatprep.subr.mxu1 %v107_v19 }
  0x1f   :  { %278 = vmatpush3.msra.mxu1 %v107_v19 }
  0x20   :  { %279 = vmatprep.subr.mxu1 %v106_v20 }
  0x21   :  { %280 = vmatpush3.msra.mxu1 %v106_v20 }
  0x22   :  { %281 = vmatprep.subr.mxu1 %v105_v21 }
  0x23   :  { %282 = vmatpush3.msra.mxu1 %v105_v21 }
  0xca   :  { %v250_v22 = vpop.f32.mrf.mxu0 }
  0xcb   :  { %v104_v25 = vmax.f32 %v250_v22, 0.0 }
  0xcc   :  { %v94_v23 = vpop.f32.mrf.mxu0 }
  0xcd   :  { %v103_v24 = vmax.f32 %v94_v23, 0.0 }
  0xcf   :  { %283 = vmatprep.mubr.f32.mxu1 %v103_v24 }
  0xd0   :  { %284 = vmatmul.mubr.f32.vlgmr.msra.gmra.mxu1 %v104_v25 }
 0x190   :  { %v285_v26 = vpop.f32.mrf.mxu1 }
 0x191   :  { %197 = vst.msk [vmem:[#allocation2 + $0x8] sm:$0xff] %vm21_vm0, %v285_v26 }
 0x192   :  { %v187_v27 = vpop.f32.mrf.mxu1 }
 0x193   :  { %196 = vst.msk [vmem:[#allocation2] sm:$0xff] %vm21_vm0, %v187_v27 }
 0x194   :  { %300 = shalt.err (!%p297_p4)
}
 0x195   :  { %s312_s2 = smov 128   ;;  %s313_s30 = smov 8  }
 0x196   :  { %209 = dma.vmem_to_hbm [thread:$0]  %s204_s28, 256, %s410_s3, [#allocation3], %s312_s2, %s312_s2, %s313_s30  }
 0x197   :  { %309 = dma.done.wait [#allocation3], 256  }
 0x198   :  { %310 = vsyncadd [#allocation3], 4294967040 }
 0x199   :  { %213 = vsyncpa [#allocation3], 1 }

</bundles_post_ra>
